<compile_context>
chip_gen: v5e
topology: v5e:2x2
jax: 0.10.0
libtpu: 0.0.40
codegen_flags: <defaults>
</compile_context>

<pallas_src>
import jax
import jax.numpy as jnp
from jax import lax
from jax.experimental import pallas as pl
from jax.experimental.pallas import tpu as pltpu


# ----------------------------------------------------------------------------
# Pallas kernel bodies
# ----------------------------------------------------------------------------
def _assemble_body(nctx_ref, frames_ref, ctx_ref, out_ref):
    # frames_ref : (1, C_BLK, seq, D)  frozen embeddings (ctx rows = don't care)
    # ctx_ref    : (1, seq, D)         learned ctx, zero-padded into a seq frame
    # out_ref    : (1, C_BLK, seq, D)  assembled prompts for this (half, block)
    s = pl.program_id(0)                # 0 = negative half, 1 = positive half
    n_ctx = nctx_ref[s]                 # SMEM scalar: n_ctx for this half
    seq = frames_ref.shape[2]
    d = frames_ref.shape[3]
    row = lax.broadcasted_iota(jnp.int32, (seq, d), 0)
    is_ctx = jnp.logical_and(row >= 1, row < 1 + n_ctx)          # (seq, D)
    # Single full-tile select + one unmasked store.
    out_ref[...] = jnp.where(is_ctx[None, None, :, :],
                             ctx_ref[...][:, None, :, :],
                             frames_ref[...])


def _fused_kernel(nctx_ref, frames_ref, ctx_ref, out_ref):
    _assemble_body(nctx_ref, frames_ref, ctx_ref, out_ref)


def _fused_gather_kernel(nctx_ref, cid_ref, frames_ref, ctx_ref, out_ref):
    del cid_ref  # only used by the index_maps (DMA-side class gather)
    _assemble_body(nctx_ref, frames_ref, ctx_ref, out_ref)


# ----------------------------------------------------------------------------
# Wrappers
# ----------------------------------------------------------------------------
def _choose_c_block(n_cls, seq, d, itemsize, target_bytes=4 << 20, cap=128):
    """Biggest class batch whose tile stays ~4 MiB (safe for v7x VMEM too)."""
    per_class = seq * d * itemsize
    c = max(1, min(n_cls, cap, target_bytes // max(per_class, 1)))
    return int(c)


def assemble_prompts_fused(frames, ctx_pad, nctx, *, c_block=None):
    """(2, n_cls, seq, D) frames + (2, seq, D) padded ctx -> (2*n_cls, seq, D)."""
    _, n_cls, seq, d = frames.shape
    if c_block is None:
        c_block = _choose_c_block(n_cls, seq, d, frames.dtype.itemsize)
    grid = (2, pl.cdiv(n_cls, c_block))

    out = pl.pallas_call(
        _fused_kernel,
        out_shape=jax.ShapeDtypeStruct((2, n_cls, seq, d), frames.dtype),
        grid_spec=pltpu.PrefetchScalarGridSpec(
            num_scalar_prefetch=1,
            grid=grid,
            in_specs=[
                pl.BlockSpec((1, c_block, seq, d), lambda s, c, nctx: (s, c, 0, 0)),
                # ctx block index is constant along the class axis -> re-DMA'd
                # only when the half switches.
                pl.BlockSpec((1, seq, d), lambda s, c, nctx: (s, 0, 0)),
            ],
            out_specs=pl.BlockSpec((1, c_block, seq, d),
                                   lambda s, c, nctx: (s, c, 0, 0)),
        ),
        compiler_params=pltpu.CompilerParams(
            dimension_semantics=("parallel", "parallel")),
    )(nctx, frames, ctx_pad)
    return out.reshape(2 * n_cls, seq, d)


def assemble_prompts_gather(frames, ctx_pad, nctx, cls_id):
    """cls_id path: class gather folded into the DMA index_map (scalar prefetch)."""
    _, _, seq, d = frames.shape
    n_sel = cls_id.shape[0]
    grid = (2, n_sel)

    out = pl.pallas_call(
        _fused_gather_kernel,
        out_shape=jax.ShapeDtypeStruct((2, n_sel, seq, d), frames.dtype),
        grid_spec=pltpu.PrefetchScalarGridSpec(
            num_scalar_prefetch=2,
            grid=grid,
            in_specs=[
                pl.BlockSpec((1, 1, seq, d),
                             lambda s, c, nctx, cid: (s, cid[c], 0, 0)),
                pl.BlockSpec((1, seq, d),
                             lambda s, c, nctx, cid: (s, 0, 0)),
            ],
            out_specs=pl.BlockSpec((1, 1, seq, d),
                                   lambda s, c, nctx, cid: (s, c, 0, 0)),
        ),
        compiler_params=pltpu.CompilerParams(
            dimension_semantics=("parallel", "arbitrary")),
    )(nctx, cls_id, frames, ctx_pad)
    return out.reshape(2 * n_sel, seq, d)


# ----------------------------------------------------------------------------
# MLCPromptLearner (JAX / Pallas) — generic-context (non-CSC) variant
# ----------------------------------------------------------------------------
class MLCPromptLearner:
    def __init__(self, key, n_cls, n_ctx_pos, n_ctx_neg, ctx_dim, seq_len,
                 dtype=jnp.float32):
        assert seq_len > 1 + max(n_ctx_pos, n_ctx_neg)
        self.n_cls = n_cls
        self.n_ctx_pos = n_ctx_pos
        self.n_ctx_neg = n_ctx_neg
        self.ctx_dim = ctx_dim
        self.seq_len = seq_len

        k = jax.random.split(key, 7)
        # Learned context parameters (nn.init.normal_(std=0.02), generic ctx).
        self.ctx_pos = 0.02 * jax.random.normal(k[0], (n_ctx_pos, ctx_dim), dtype)
        self.ctx_neg = 0.02 * jax.random.normal(k[1], (n_ctx_neg, ctx_dim), dtype)

        # Frozen buffers standing in for clip_model.token_embedding(...):
        # TODO(synk): the real module builds these from a CLIP tokenizer +
        # token_embedding on the host; here they are synthetic frozen buffers.
        emb_pos = jax.random.normal(k[2], (n_cls, seq_len, ctx_dim), dtype)
        emb_neg = jax.random.normal(k[3], (n_cls, seq_len, ctx_dim), dtype)
        self.token_prefix_pos = emb_pos[:, :1, :]
        self.token_suffix_pos = emb_pos[:, 1 + n_ctx_pos:, :]
        self.token_prefix_neg = emb_neg[:, :1, :]
        self.token_suffix_neg = emb_neg[:, 1 + n_ctx_neg:, :]

        # One-time (init) build of the kernel-facing "frames": full (seq, D)
        # embeddings per class with the ctx rows zeroed (the kernel overwrites
        # them).  Negative half first, matching cat([neg, pos]).
        frame_pos = jnp.concatenate(
            [self.token_prefix_pos,
             jnp.zeros((n_cls, n_ctx_pos, ctx_dim), dtype),
             self.token_suffix_pos], axis=1)
        frame_neg = jnp.concatenate(
            [self.token_prefix_neg,
             jnp.zeros((n_cls, n_ctx_neg, ctx_dim), dtype),
             self.token_suffix_neg], axis=1)
        self.frames = jnp.stack([frame_neg, frame_pos], axis=0)   # (2,n_cls,seq,D)
        self.nctx = jnp.array([n_ctx_neg, n_ctx_pos], jnp.int32)  # SMEM prefetch

        # Synthetic tokenized prompts (int32 token ids), neg first then pos,
        # matching torch.cat([tokenized_prompts_neg, tokenized_prompts_pos]).
        tok_pos = jax.random.randint(k[4], (n_cls, seq_len), 0, 49408, jnp.int32)
        tok_neg = jax.random.randint(k[5], (n_cls, seq_len), 0, 49408, jnp.int32)
        self.tokenized_prompts = jnp.concatenate([tok_neg, tok_pos], axis=0)

    # Pad the learned contexts into (2, seq, D) frames aligned with the output
    # token rows (row 0 unused, rows 1..1+n_ctx carry ctx).  Tiny per-call op.
    def _ctx_frame(self):
        seq, d, dt = self.seq_len, self.ctx_dim, self.ctx_pos.dtype
        ctx_pad = jnp.zeros((2, seq, d), dt)
        ctx_pad = ctx_pad.at[0, 1:1 + self.n_ctx_neg, :].set(self.ctx_neg)
        ctx_pad = ctx_pad.at[1, 1:1 + self.n_ctx_pos, :].set(self.ctx_pos)
        return ctx_pad

    def __call__(self, cls_id=None):
        ctx_pad = self._ctx_frame()
        if cls_id is None:
            prompts = assemble_prompts_fused(self.frames, ctx_pad, self.nctx)
            tokenized = self.tokenized_prompts
        else:
            cls_id = jnp.asarray(cls_id, jnp.int32)
            prompts = assemble_prompts_gather(self.frames, ctx_pad, self.nctx,
                                              cls_id)
            tok_pos = jnp.take(self.tokenized_prompts[self.n_cls:], cls_id, axis=0)
            tok_neg = jnp.take(self.tokenized_prompts[:self.n_cls], cls_id, axis=0)
            tokenized = jnp.concatenate([tok_neg, tok_pos], axis=0)
        return prompts, tokenized

    # Pure-JAX reference (mirrors the PyTorch forward) for verification.
    def reference(self, cls_id=None):
        if cls_id is None:
            prefix_pos, prefix_neg = self.token_prefix_pos, self.token_prefix_neg
            suffix_pos, suffix_neg = self.token_suffix_pos, self.token_suffix_neg
            n = self.n_cls
            tokenized = self.tokenized_prompts
        else:
            cls_id = jnp.asarray(cls_id, jnp.int32)
            prefix_pos = jnp.take(self.token_prefix_pos, cls_id, axis=0)
            prefix_neg = jnp.take(self.token_prefix_neg, cls_id, axis=0)
            suffix_pos = jnp.take(self.token_suffix_pos, cls_id, axis=0)
            suffix_neg = jnp.take(self.token_suffix_neg, cls_id, axis=0)
            n = cls_id.shape[0]
            tok_pos = jnp.take(self.tokenized_prompts[self.n_cls:], cls_id, axis=0)
            tok_neg = jnp.take(self.tokenized_prompts[:self.n_cls], cls_id, axis=0)
            tokenized = jnp.concatenate([tok_neg, tok_pos], axis=0)
        ctx_pos = jnp.broadcast_to(self.ctx_pos[None], (n,) + self.ctx_pos.shape)
        ctx_neg = jnp.broadcast_to(self.ctx_neg[None], (n,) + self.ctx_neg.shape)
        p_pos = jnp.concatenate([prefix_pos, ctx_pos, suffix_pos], axis=1)
        p_neg = jnp.concatenate([prefix_neg, ctx_neg, suffix_neg], axis=1)
        return jnp.concatenate([p_neg, p_pos], axis=0), tokenized


if __name__ == "__main__":
    key = jax.random.PRNGKey(0)

    # Small shapes consistent with the module: n_cls classes, a 16-token
    # context window (CLIP uses 77), 128-dim token embeddings.
    n_cls, n_ctx_pos, n_ctx_neg, ctx_dim, seq_len = 4, 4, 3, 128, 16

    learner = MLCPromptLearner(key, n_cls, n_ctx_pos, n_ctx_neg, ctx_dim, seq_len)

    # cls_id=None path (fused, class-batched kernel)
    prompts, tokenized = learner(cls_id=None)
    prompts = jax.block_until_ready(prompts)
    tokenized = jax.block_until_ready(tokenized)

    ref_prompts, ref_tok = learner.reference(cls_id=None)
    assert prompts.shape == (2 * n_cls, seq_len, ctx_dim)
    assert tokenized.shape == (2 * n_cls, seq_len)
    assert jnp.allclose(prompts, ref_prompts)
    assert jnp.array_equal(tokenized, ref_tok)

    # cls_id path (scalar-prefetch gather kernel)
    cls_id = jnp.array([2, 0], jnp.int32)
    prompts2, tokenized2 = learner(cls_id=cls_id)
    prompts2 = jax.block_until_ready(prompts2)
    ref_prompts2, ref_tok2 = learner.reference(cls_id=cls_id)
    assert prompts2.shape == (2 * cls_id.shape[0], seq_len, ctx_dim)
    assert jnp.allclose(prompts2, ref_prompts2)
    assert jnp.array_equal(tokenized2, ref_tok2)

    print("KERNEL_OK")
</pallas_src>

<mosaic_0001>
module attributes {stable_mosaic.version = 11 : i64} {
  func.func @_fused_kernel(%arg0: i32, %arg1: i32, %arg2: memref<2xi32, #tpu.memory_space<smem>>, %arg3: memref<1x4x16x128xf32, #tpu.memory_space<vmem>>, %arg4: memref<1x16x128xf32, #tpu.memory_space<vmem>>, %arg5: memref<1x4x16x128xf32, #tpu.memory_space<vmem>>) attributes {dimension_semantics = [#tpu.dimension_semantics<parallel>, #tpu.dimension_semantics<parallel>], iteration_bounds = array<i64: 2, 1>, scalar_prefetch = 1 : i64, scratch_operands = 0 : i64, tpu.core_type = #tpu.core_type<tc>, window_params = [{transform_indices = @transform_0, window_bounds = array<i64: 1, 4, 16, 128>}, {transform_indices = @transform_1, window_bounds = array<i64: 1, 16, 128>}, {transform_indices = @transform_2, window_bounds = array<i64: 1, 4, 16, 128>}]} {
    %0 = arith.index_cast %arg0 : i32 to index
    %1 = memref.load %arg2[%0] : memref<2xi32, #tpu.memory_space<smem>>
    %2 = tpu.iota {dimensions = array<i32: 0>} : vector<16x128xi32>
    %c1_i32 = arith.constant 1 : i32
    %3 = vector.broadcast %c1_i32 : i32 to vector<16x128xi32>
    %4 = arith.cmpi sge, %2, %3 : vector<16x128xi32>
    %c1_i32_0 = arith.constant 1 : i32
    %5 = arith.addi %c1_i32_0, %1 : i32
    %6 = vector.broadcast %5 : i32 to vector<16x128xi32>
    %7 = arith.cmpi slt, %2, %6 : vector<16x128xi32>
    %8 = arith.andi %4, %7 : vector<16x128xi1>
    %9 = vector.shape_cast %8 : vector<16x128xi1> to vector<1x1x16x128xi1>
    %c0 = arith.constant 0 : index
    %c0_1 = arith.constant 0 : index
    %c0_2 = arith.constant 0 : index
    %10 = vector.load %arg4[%c0, %c0_1, %c0_2] : memref<1x16x128xf32, #tpu.memory_space<vmem>>, vector<1x16x128xf32>
    %11 = vector.shape_cast %10 : vector<1x16x128xf32> to vector<1x1x16x128xf32>
    %c0_3 = arith.constant 0 : index
    %c0_4 = arith.constant 0 : index
    %c0_5 = arith.constant 0 : index
    %c0_6 = arith.constant 0 : index
    %12 = vector.load %arg3[%c0_3, %c0_4, %c0_5, %c0_6] : memref<1x4x16x128xf32, #tpu.memory_space<vmem>>, vector<1x4x16x128xf32>
    %13 = vector.shape_cast %9 : vector<1x1x16x128xi1> to vector<1x1x16x128xi1>
    %14 = vector.broadcast %13 : vector<1x1x16x128xi1> to vector<1x4x16x128xi1>
    %15 = vector.shape_cast %11 : vector<1x1x16x128xf32> to vector<1x1x16x128xf32>
    %16 = vector.broadcast %15 : vector<1x1x16x128xf32> to vector<1x4x16x128xf32>
    %17 = arith.select %14, %16, %12 : vector<1x4x16x128xi1>, vector<1x4x16x128xf32>
    %c0_7 = arith.constant 0 : index
    %c0_8 = arith.constant 0 : index
    %c0_9 = arith.constant 0 : index
    %c0_10 = arith.constant 0 : index
    %18 = vector.load %arg5[%c0_7, %c0_8, %c0_9, %c0_10] : memref<1x4x16x128xf32, #tpu.memory_space<vmem>>, vector<1x4x16x128xf32>
    tpu.vector_store %arg5[%c0_7, %c0_8, %c0_9, %c0_10], %17 {strides = array<i32>} : memref<1x4x16x128xf32, #tpu.memory_space<vmem>>, vector<1x4x16x128xf32>,
    return
  }
  func.func @transform_0(%arg0: i32, %arg1: i32, %arg2: memref<2xi32, #tpu.memory_space<smem>>) -> (i32, i32, i32, i32) {
    %c0_i32 = arith.constant 0 : i32
    %c0_i32_0 = arith.constant 0 : i32
    %c0_i32_1 = arith.constant 0 : i32
    return %arg0, %arg1, %c0_i32, %c0_i32_0 : i32, i32, i32, i32
  }
  func.func @transform_1(%arg0: i32, %arg1: i32, %arg2: memref<2xi32, #tpu.memory_space<smem>>) -> (i32, i32, i32) {
    %c0_i32 = arith.constant 0 : i32
    %c0_i32_0 = arith.constant 0 : i32
    %c0_i32_1 = arith.constant 0 : i32
    return %arg0, %c0_i32, %c0_i32_0 : i32, i32, i32
  }
  func.func @transform_2(%arg0: i32, %arg1: i32, %arg2: memref<2xi32, #tpu.memory_space<smem>>) -> (i32, i32, i32, i32) {
    %c0_i32 = arith.constant 0 : i32
    %c0_i32_0 = arith.constant 0 : i32
    %c0_i32_1 = arith.constant 0 : i32
    return %arg0, %arg1, %c0_i32, %c0_i32_0 : i32, i32, i32, i32
  }
}

</mosaic_0001>

<bundles_post_ra>
// kernel: tpu_custom_call.1
= control target key start
LH: loop header
LB: loop body
LE: loop exit
PB: predicated region body
PF: predicated region fallthrough
CT: control target
= control target key end

     0   :  { %s663_s15 = smov [#allocation3]   ;;  %s866_s0 = inlined_call_operand.hbm [shape: s32[2], index: 0, kind: input, shape index: {}]   ;;  %s867_s1 = inlined_call_operand.hbm [shape: f32[2,4,16,128], index: 1, kind: input, shape index: {}]   ;;  %s868_s2 = inlined_call_operand.hbm [shape: f32[2,16,128], index: 2, kind: input, shape index: {}]   ;;  %s869_s3 = inlined_call_operand.hbm [shape: f32[2,4,16,128], index: 3, kind: output, shape index: {}]  }
   0x1   :  { %s9_s14 = sshll.u32 %s866_s0, 4  ;;  %s10_s14 = int_to_ptr.hbm [resolvable:$true] %s9_s14 }
   0x2   :  { %12 = dma.hbm_to_smem %s10_s14, 16, %s663_s15, [#allocation2] }
   0x3   :  { %625 = dma.done.wait [#allocation2], 16 }
   0x4   :  { %626 = vsyncadd [#allocation2], 4294967280 }
   0x5   :  { %15 = sfence }
   0x6   :  { %16 = vsyncpa [#allocation5], 0 }
   0x7   :  { %18 = vsyncpa [#allocation5 + $0x1], 0 }
   0x8   :  { %19 = vsyncpa [#allocation8], 0 }
   0x9   :  { %21 = vsyncpa [#allocation8 + $0x1], 0 }
   0xa   :  { %22 = vsyncpa [#allocation6], 0 }
   0xb   :  { %24 = vsyncpa [#allocation6 + $0x1], 0  ;;  %s691_s16 = smov 0   ;;  %s693_s17 = smov 0  }
   0xc   :  { %s695_s18 = smov 0   ;;  %s697_s19 = smov 0  }
   0xd   :  { %s699_s0 = smov 0   ;;  %s701_s20 = smov 0  }
   0xe LB: > { %s407_s21 = sadd.s32 4294967295, %s661_s20   ;;  %s408_s22 = sadd.s32 4294967294, %s661_s20   ;;  %s661_s20 = sphi %s701_s20, %s30_s20   ;;  %s657_s0 = sphi %s699_s0, %s881_s0   ;;  %s653_s19 = sphi %s697_s19, %s880_s19   ;;  %s649_s18 = sphi %s695_s18, %s879_s18   ;;  %s645_s17 = sphi %s693_s17, %s878_s17   ;;  %s641_s16 = sphi %s691_s16, %s877_s16  }
   0xf   : > { %s42_s23 = sadd.s32 1, %s657_s0  ;;  %s51_s24 = sadd.s32 1, %s649_s18 }
  0x10   : > { %p44_p0 = scmp.ge.s32.totalorder %s42_s23, 2  ;;  %p58_p1 = scmp.ne.s32.totalorder %s649_s18, %s645_s17 }
  0x11   : > { %p59_p2 = scmp.eq.s32.totalorder %s661_s20, 0  ;;  %p64_p3 = scmp.ne.s32.totalorder %s645_s17, %s641_s16 }
  0x12   : > { %s883_s23 = smov (%p44_p0, %s42_s23), 0  ;;  %p65_p5 = scmp.eq.s32.totalorder %s407_s21, 0 }
  0x13   : > { %p732_p4 = por %p59_p2, %p58_p1  ;;  %s46_s26 = ssub.s32 %s657_s0, %s883_s23 }
  0x14   : > { %p116_p6 = scmp.eq.s32.totalorder %s407_s21, 1  ;;  %p49_p7 = scmp.eq.s32.totalorder %s46_s26, 0 }
  0x15   : > { %p738_p8 = por %p65_p5, %p64_p3  ;;  %p122_p10 = scmp.eq.s32.totalorder %s408_s22, 1 }
  0x16   : > { %p742_p9 = por %p116_p6, %p58_p1  ;;  %p410_p12 = scmp.ge.s32.totalorder %s661_s20, 2 }
  0x17   : > { %s747_s29 = scalar_select %p49_p7, %s649_s18, %s51_s24  }
  0x18   : > { %p749_p11 = por %p122_p10, %p64_p3  ;;  %p446_p13 = scmp.lt.s32.totalorder %s661_s20, 2 }
  0x19   : > { %s756_s4 = sand.u32 1, %s649_s18   ;;  %s426_s6 = sshll.u32 %s657_s0, 6 }
  0x1a   : > { %s411_s5 = sshll.u32 %s756_s4, 6  ;;  %s154_s9 = scalar_lea.hbm %s867_s1, %s426_s6 }
  0x1b   : > { %s146_s10 = scalar_lea.vmem [#allocation4], %s411_s5  ;;  %s155_s12 = sshll.u32 %s154_s9, 4  ;;  %s156_s12 = int_to_ptr.hbm [resolvable:$true] %s155_s12 }
  0x1c   : > { %s157_s11 = sshll.u32 %s146_s10, 4  ;;  %p765_p0 = pnand %p446_p13, %p732_p4  ;;  %s158_s11 = int_to_ptr.vmem [resolvable:$true] %s157_s11 }
  0x1d   : > { %p417_p1 = scmp.ge.s32.totalorder %s661_s20, 1  ;;  %s143_s14 = scalar_lea.sflag [#allocation5], %s756_s4 }
  0x1e   : > { %s664_s15 = smov 128   ;;  %s665_s21 = smov 8  }
  0x1f   : > { %438 = dma.hbm_to_vmem [thread:$0]  (!%p765_p0), %s156_s12, 1024, %s158_s11, %s143_s14, %s664_s15, %s664_s15, %s665_s21  }
  0x20   : > { %p187_p2 = scmp.lt.s32.totalorder %s661_s20, 3  ;;  %s414_s22 = sshll.u32 %s756_s4, 4 }
  0x21   : > { %s427_s24 = sshll.u32 %s657_s0, 4  ;;  %s171_s6 = scalar_lea.vmem [#allocation7], %s414_s22 }
  0x22   : > { %p188_p3 = pnand %p417_p1, %p187_p2  ;;  %s176_s25 = scalar_lea.hbm %s868_s2, %s427_s24 }
  0x23   : > { %s179_s7 = sshll.u32 %s171_s6, 4  ;;  %s177_s8 = sshll.u32 %s176_s25, 4  ;;  %s180_s7 = int_to_ptr.vmem [resolvable:$true] %s179_s7  ;;  %s178_s8 = int_to_ptr.hbm [resolvable:$true] %s177_s8 }
  0x24   : > { %s168_s9 = scalar_lea.sflag [#allocation8], %s756_s4  ;;  %191 = sbr.rel (%p188_p3) target bundleno = 66 (0x42), region = 28 }
  0x25   : > { %441 = dma.hbm_to_vmem [thread:$0]  (!%p765_p0), %s178_s8, 256, %s180_s7, %s168_s9, %s664_s15, %s664_s15, %s665_s21  }
  0x26   : > { %s783_s10 = sand.u32 (!%p188_p3), 1, %s645_s17  }
  0x27   : > { %s418_s11 = sshll.u32 (!%p188_p3), %s783_s10, 6  ;;  %s194_s12 = scalar_lea.sflag (!%p188_p3), [#allocation5], %s783_s10 }
  0x28   : > { %s789_s14 = scalar_lea.vmem (!%p188_p3), [#allocation4], %s418_s11 }
  0x29   : > { %628 = dma.done.wait (%p738_p8), %s194_s12, 1024  }
  0x2a   : > { %630 = vsyncadd (%p738_p8), %s194_s12, 4294966272  ;;  %s419_s4 = sshll.u32 %s783_s10, 4  ;;  %s204_s13 = scalar_lea.sflag [#allocation8], %s783_s10 }
  0x2b   : > { %s207_s15 = scalar_lea.vmem [#allocation7], %s419_s4 }
  0x2c   : > { %632 = dma.done.wait (%p738_p8), %s204_s13, 256  }
  0x2d   : > { %634 = vsyncadd (%p738_p8), %s204_s13, 4294967040  ;;  %v237_v0 = vlaneseq  ;;  %s236_s21 = sld [smem:[#allocation3 + %s653_s19]]  ;;  %v248_v3 = vld [vmem:[%s207_s15] sm:$0xff]  ;;  %v249_v5 = vld [vmem:[%s207_s15 + $0x8] sm:$0xff]  ;;  %s428_s27 = sshll.u32 %s653_s19, 6 }
  0x2e   : > { %v250_v4 = vld [vmem:[%s789_s14] sm:$0xff]  ;;  %v251_v7 = vld [vmem:[%s789_s14 + $0x8] sm:$0xff]  ;;  %v252_v8 = vld [vmem:[%s789_s14 + $0x10] sm:$0xff]  ;;  %s293_s19 = scalar_lea.hbm %s869_s3, %s428_s27  ;;  %s233_s5 = scalar_lea.vmem [#allocation9], %s418_s11 }
  0x2f   : > { %v238_v1 = vshrl.u32 %v237_v0, 7  ;;  %v253_v9 = vld [vmem:[%s789_s14 + $0x18] sm:$0xff]  ;;  %v254_v10 = vld [vmem:[%s789_s14 + $0x20] sm:$0xff]  ;;  %v255_v13 = vld [vmem:[%s789_s14 + $0x28] sm:$0xff]  ;;  %s294_s25 = sshll.u32 %s233_s5, 4  ;;  %s296_s6 = sshll.u32 %s293_s19, 4  ;;  %s295_s25 = int_to_ptr.vmem [resolvable:$true] %s294_s25  ;;  %s297_s6 = int_to_ptr.hbm [resolvable:$true] %s296_s6 }
  0x30   : > { %v256_v17 = vld [vmem:[%s789_s14 + $0x30] sm:$0xff]  ;;  %v257_v19 = vld [vmem:[%s789_s14 + $0x38] sm:$0xff]  ;;  %s279_s7 = scalar_lea.sflag [#allocation6], %s783_s10  ;;  %s587_s8 = sshra.s32 %s297_s6, 4  ;;  %s588_s8 = int_to_ptr.hbm [resolvable:$true] %s587_s8 }
  0x31   : > { %v239_v2 = vadd.s32 8, %v238_v1  ;;  %vm240_vm0 = vcmp.ge.s32.totalorder %v238_v1, 1  ;;  %s589_s9 = scalar_lea.hbm %s588_s8, 64  ;;  %s593_s14 = scalar_lea.hbm %s869_s3, 128 }
  0x32   : > { %p590_p4 = scmp.ne.s32.totalorder %s588_s8, %s589_s9  ;;  %p594_p7 = scmp.lt.s32.totalorder %s588_s8, %s869_s3 }
  0x33   : > { %s242_s22 = sadd.s32 1, %s236_s21  ;;  %p595_p8 = scmp.lt.s32.totalorder %s593_s14, %s589_s9 }
  0x34   : > { %v243_v6 = vstv %s242_s22  ;;  %p591_p5 = pnand %p590_p4, %p742_p9 }
  0x35   : > { %vm244_vm1 = vcmp.lt.s32.totalorder %v238_v1, %v243_v6  ;;  %vm245_vm2 = vcmp.lt.s32.totalorder %v239_v2, %v243_v6  ;;  %p596_p10 = por %p595_p8, %p594_p7 }
  0x36   : > { %vm808_vm3 = vmand %vm240_vm0, %vm244_vm1  ;;  %v263_v12 = vsel %vm245_vm2, %v249_v5, %v251_v7  ;;  %v265_v16 = vsel %vm245_vm2, %v249_v5, %v253_v9  ;;  %v267_v20 = vsel %vm245_vm2, %v249_v5, %v255_v13  ;;  %v269_v22 = vsel %vm245_vm2, %v249_v5, %v257_v19  ;;  %p592_p6 = pneg %p591_p5 }
  0x37   : > { %v262_v14 = vsel %vm808_vm3, %v248_v3, %v250_v4  ;;  %271 = vst [vmem:[%s233_s5 + $0x8] sm:$0xff] %v263_v12  ;;  %v264_v15 = vsel %vm808_vm3, %v248_v3, %v252_v8  ;;  %v266_v18 = vsel %vm808_vm3, %v248_v3, %v254_v10  ;;  %v268_v21 = vsel %vm808_vm3, %v248_v3, %v256_v17 }
  0x38   : > { %270 = vst [vmem:[%s233_s5] sm:$0xff] %v262_v14  ;;  %p597_p13 = pnand %p596_p10, %p592_p6 }
  0x39   : > { %272 = vst [vmem:[%s233_s5 + $0x10] sm:$0xff] %v264_v15 }
  0x3a   : > { %273 = vst [vmem:[%s233_s5 + $0x18] sm:$0xff] %v265_v16 }
  0x3b   : > { %274 = vst [vmem:[%s233_s5 + $0x20] sm:$0xff] %v266_v18 }
  0x3c   : > { %275 = vst [vmem:[%s233_s5 + $0x28] sm:$0xff] %v267_v20 }
  0x3d   : > { %276 = vst [vmem:[%s233_s5 + $0x30] sm:$0xff] %v268_v21 }
  0x3e   : > { %277 = vst [vmem:[%s233_s5 + $0x38] sm:$0xff] %v269_v22 }
  0x3f   : > { %600 = shalt.err (!%p597_p13)
}
  0x40   : > { %s666_s10 = smov 128   ;;  %s667_s15 = smov 8  }
  0x41   : > { %433 = dma.vmem_to_hbm [thread:$0]  (%p742_p9), %s295_s25, 1024, %s297_s6, %s279_s7, %s666_s10, %s666_s10, %s667_s15  }
  0x42 PF: > { %s311_s21 = sand.u32 1, %s641_s16   ;;  %p443_p0 = pnand %p410_p12, %p749_p11 }
  0x43   : > { %s312_s22 = scalar_lea.sflag [#allocation6], %s311_s21 }
  0x44   : > { %p444_p1 = pneg %p443_p0 }
  0x46   : > { %636 = dma.done.wait (%p444_p1), %s312_s22, 1024  }
  0x47   : > { %638 = vsyncadd (%p444_p1), %s312_s22, 4294966272  ;;  %s30_s20 = sadd.s32 1, %s661_s20   ;;  %s877_s16 = smov %s645_s17 }
  0x48   : > { %p27_p2 = scmp.ge.s32.totalorder %s30_s20, 4   ;;  %s878_s17 = smov %s649_s18 }
  0x49   : > { %s879_s18 = smov %s747_s29  ;;  %s880_s19 = smov %s657_s0 }
  0x4a   : > { %s881_s0 = smov %s883_s23  ;;  %29 = sbr.rel (!%p27_p2) target bundleno = 14 (0xe), region = 86 }
  0x4f   :  { %318 = vsyncpa [#allocation5], 1 }
  0x50   :  { %320 = vsyncpa [#allocation5 + $0x1], 1 }
  0x51   :  { %321 = vsyncpa [#allocation8], 1 }
  0x52   :  { %323 = vsyncpa [#allocation8 + $0x1], 1 }
  0x53   :  { %324 = vsyncpa [#allocation6], 1 }
  0x54   :  { %326 = vsyncpa [#allocation6 + $0x1], 1 }

</bundles_post_ra>
